<compile_context>
chip_gen: v6e
topology: v6e:2x2x1
jax: 0.10.0
libtpu: 0.0.40
codegen_flags: <defaults>
</compile_context>

<pallas_src>
import jax
import jax.numpy as jnp
from jax.experimental import pallas as pl
from jax.experimental.pallas import tpu as pltpu


def _round_up(n, m):
    return ((n + m - 1) // m) * m


def _default_tile_b():
    """Generation-aware default batch tile (rows). Falls back to 8192."""
    try:
        kind = jax.devices()[0].device_kind.lower()
    except Exception:
        return 8192
    if "v5 lite" in kind or "v5e" in kind or "v5lite" in kind:
        return 4096
    if "v7" in kind:
        return 16384
    return 8192


def _select_tile(batch, tile_b):
    """Pick (tile, padded_batch). tile is a multiple of 16 (512 when large)."""
    b16 = _round_up(batch, 16)
    tile = _round_up(max(int(tile_b), 512), 512)
    # Keep >= 2 grid steps when the batch allows, so v7x can shard the batch
    # axis across its two TensorCores (harmless on v5e/v6e).
    if b16 >= 1024:
        tile = min(tile, max(512, (b16 // 2) // 512 * 512))
    if tile >= b16:
        tile = b16                      # single block == full (padded) batch
    b_pad = _round_up(batch, tile)
    return tile, b_pad


def critic_kernel(x_ref, w1_ref, b1_ref, w2_ref, b2_ref, w3_ref, b3_ref, o_ref):
    # Stream x at its HBM dtype (f32) and cast on the VPU right before the MXU
    # (no separate wrapper-side astype pass over HBM).
    x = x_ref[...].astype(w1_ref.dtype)

    # Layer 1: MXU matmul, f32 accumulation; bias + ReLU in f32 on the VPU.
    h1 = jnp.dot(x, w1_ref[...], preferred_element_type=jnp.float32) + b1_ref[...]
    h1 = jnp.maximum(h1, 0.0)

    # Layer 2: cast activations back to the weight dtype for the MXU.
    h2 = jnp.dot(h1.astype(w2_ref.dtype), w2_ref[...],
                 preferred_element_type=jnp.float32) + b2_ref[...]
    h2 = jnp.maximum(h2, 0.0)

    # Layer 3: contract the hidden dims as (1, hidden) x (tile, hidden)^T so the
    # result is a lane-dense (1, tile) row (full-lane store, no masked vst).
    out_row = jax.lax.dot_general(
        w3_ref[...], h2.astype(w3_ref.dtype),
        dimension_numbers=(((1,), (1,)), ((), ())),
        preferred_element_type=jnp.float32) + b3_ref[0, 0]

    o_ref[...] = out_row[None].astype(o_ref.dtype)


def prepare_params(params, compute_dtype=jnp.bfloat16):
    """Cast the matmul weights ONCE (not per forward call); biases stay f32."""
    hidden = params["w1"].shape[1]
    return {
        "w1": params["w1"].astype(compute_dtype),
        "b1": params["b1"].reshape(1, hidden).astype(jnp.float32),
        "w2": params["w2"].astype(compute_dtype),
        "b2": params["b2"].reshape(1, hidden).astype(jnp.float32),
        "w3": params["w3"].reshape(1, hidden).astype(compute_dtype),
        "b3": params["b3"].reshape(1, 1).astype(jnp.float32),
    }


def critic_net_forward(x, prepared, *, tile_b=None):
    """x: (B, input_dim) float32. prepared: output of prepare_params()."""
    B, input_dim = x.shape
    hidden = prepared["w1"].shape[1]
    assert prepared["w1"].shape[0] == input_dim

    if tile_b is None:
        tile_b = _default_tile_b()
    tile, b_pad = _select_tile(B, tile_b)
    if b_pad != B:
        x = jnp.pad(x, ((0, b_pad - B), (0, 0)))
    num_tiles = b_pad // tile

    # VMEM budget: double-buffered f32 x tiles + f32 h1/h2 temporaries +
    # lane-dense output blocks + weights/slack, clamped to v7x's 64 MiB.
    lane = 128
    x_bytes = 2 * tile * _round_up(input_dim, lane) * 4
    h_bytes = 2 * tile * _round_up(hidden, lane) * 4
    o_bytes = 2 * 8 * _round_up(tile, lane) * 4
    vmem_limit = min(max(x_bytes + h_bytes + o_bytes + (4 << 20), 32 << 20),
                     64 << 20)

    const = lambda i: (0, 0)  # same block every step -> stays VMEM-resident

    out = pl.pallas_call(
        critic_kernel,
        out_shape=jax.ShapeDtypeStruct((num_tiles, 1, tile), jnp.float32),
        grid=(num_tiles,),
        in_specs=[
            pl.BlockSpec((tile, input_dim), lambda i: (i, 0)),      # x tile
            pl.BlockSpec((input_dim, hidden), const),               # w1
            pl.BlockSpec((1, hidden), const),                       # b1
            pl.BlockSpec((hidden, hidden), const),                  # w2
            pl.BlockSpec((1, hidden), const),                       # b2
            pl.BlockSpec((1, hidden), const),                       # w3 (row)
            pl.BlockSpec(memory_space=pltpu.MemorySpace.SMEM),      # b3 scalar
        ],
        out_specs=pl.BlockSpec((1, 1, tile), lambda i: (i, 0, 0)),  # lane-dense
        compiler_params=pltpu.CompilerParams(
            dimension_semantics=("parallel",),
            vmem_limit_bytes=int(vmem_limit),
        ),
    )(x, prepared["w1"], prepared["b1"], prepared["w2"], prepared["b2"],
      prepared["w3"], prepared["b3"])

    return out.reshape(b_pad, 1)[:B]


def init_params(key, input_dim):
    """Deterministic init mirroring nn.Linear default (U[-1/sqrt(fan_in), ...])."""
    hidden = int(input_dim * (2.0 / 3.0))
    keys = jax.random.split(key, 6)

    def linear(kw, kb, fan_in, fan_out):
        bound = 1.0 / jnp.sqrt(jnp.float32(fan_in))
        w = jax.random.uniform(kw, (fan_in, fan_out), jnp.float32, -bound, bound)
        b = jax.random.uniform(kb, (1, fan_out), jnp.float32, -bound, bound)
        return w, b

    w1, b1 = linear(keys[0], keys[1], input_dim, hidden)
    w2, b2 = linear(keys[2], keys[3], hidden, hidden)
    w3, b3 = linear(keys[4], keys[5], hidden, 1)
    return {"w1": w1, "b1": b1, "w2": w2, "b2": b2, "w3": w3, "b3": b3}, hidden


def reference_forward(x, p):
    h1 = jnp.maximum(x @ p["w1"] + p["b1"], 0.0)
    h2 = jnp.maximum(h1 @ p["w2"] + p["b2"], 0.0)
    return h2 @ p["w3"] + p["b3"]


if __name__ == "__main__":
    key = jax.random.PRNGKey(0)
    k_param, k_x, k_x2 = jax.random.split(key, 3)

    input_dim = 48          # small, consistent with the module; hidden = 32
    params, hidden = init_params(k_param, input_dim)

    # --- small-batch correctness (single tile == full padded batch) ---
    batch = 8
    x = jax.random.normal(k_x, (batch, input_dim), jnp.float32)
    ref = reference_forward(x, params)

    prep_f32 = prepare_params(params, jnp.float32)
    out_f32 = jax.block_until_ready(critic_net_forward(x, prep_f32))
    assert out_f32.shape == (batch, 1), out_f32.shape
    assert jnp.allclose(out_f32, ref, atol=2e-3, rtol=2e-3), "f32 mismatch vs reference"

    prep_bf16 = prepare_params(params, jnp.bfloat16)
    out_bf16 = jax.block_until_ready(critic_net_forward(x, prep_bf16))
    assert out_bf16.shape == (batch, 1), out_bf16.shape
    assert jnp.allclose(out_bf16, ref, atol=5e-2, rtol=5e-2), "bf16 mismatch vs reference"

    # --- multi-tile grid path: padding, >=2 grid steps, lane-dense output ---
    batch_big = 2055        # deliberately not a multiple of the tile
    x_big = jax.random.normal(k_x2, (batch_big, input_dim), jnp.float32)
    ref_big = reference_forward(x_big, params)
    out_big = jax.block_until_ready(
        critic_net_forward(x_big, prep_bf16, tile_b=1024))
    assert out_big.shape == (batch_big, 1), out_big.shape
    assert jnp.allclose(out_big, ref_big, atol=5e-2, rtol=5e-2), "tiled bf16 mismatch"

    print("KERNEL_OK")
</pallas_src>

<mosaic_0001>
module attributes {stable_mosaic.version = 11 : i64} {
  func.func @critic_kernel(%arg0: i32, %arg1: memref<16x48xf32, #tpu.memory_space<vmem>>, %arg2: memref<48x32xf32, #tpu.memory_space<vmem>>, %arg3: memref<1x32xf32, #tpu.memory_space<vmem>>, %arg4: memref<32x32xf32, #tpu.memory_space<vmem>>, %arg5: memref<1x32xf32, #tpu.memory_space<vmem>>, %arg6: memref<1x32xf32, #tpu.memory_space<vmem>>, %arg7: memref<1x1xf32, #tpu.memory_space<smem>>, %arg8: memref<1x1x16xf32, #tpu.memory_space<vmem>>) attributes {dimension_semantics = [#tpu.dimension_semantics<parallel>], iteration_bounds = array<i64: 1>, scalar_prefetch = 0 : i64, scratch_operands = 0 : i64, tpu.core_type = #tpu.core_type<tc>, window_params = [{transform_indices = @transform_0, window_bounds = array<i64: 16, 48>}, {pipeline_mode = #tpu.pipeline_mode<synchronous>, transform_indices = @transform_1, window_bounds = array<i64: 48, 32>}, {pipeline_mode = #tpu.pipeline_mode<synchronous>, transform_indices = @transform_2, window_bounds = array<i64: 1, 32>}, {pipeline_mode = #tpu.pipeline_mode<synchronous>, transform_indices = @transform_3, window_bounds = array<i64: 32, 32>}, {pipeline_mode = #tpu.pipeline_mode<synchronous>, transform_indices = @transform_4, window_bounds = array<i64: 1, 32>}, {pipeline_mode = #tpu.pipeline_mode<synchronous>, transform_indices = @transform_5, window_bounds = array<i64: 1, 32>}, {transform_indices = @transform_6, window_bounds = array<i64: 1, 1>}, {transform_indices = @transform_7, window_bounds = array<i64: 1, 1, 16>}]} {
    %c0 = arith.constant 0 : index
    %c0_0 = arith.constant 0 : index
    %0 = vector.load %arg1[%c0, %c0_0] : memref<16x48xf32, #tpu.memory_space<vmem>>, vector<16x48xf32>
    %c0_1 = arith.constant 0 : index
    %c0_2 = arith.constant 0 : index
    %1 = vector.load %arg2[%c0_1, %c0_2] : memref<48x32xf32, #tpu.memory_space<vmem>>, vector<48x32xf32>
    %cst = arith.constant dense<0.000000e+00> : vector<16x32xf32>
    %2 = tpu.matmul %0, %1, %cst {dimension_numbers = #tpu.dot_dimension_numbers<[1], [0], [0], [1], [0, 0, 1, 1], [], []>} : vector<16x48xf32>, vector<48x32xf32>, vector<16x32xf32> -> vector<16x32xf32>
    %c0_3 = arith.constant 0 : index
    %c0_4 = arith.constant 0 : index
    %3 = vector.load %arg3[%c0_3, %c0_4] : memref<1x32xf32, #tpu.memory_space<vmem>>, vector<1x32xf32>
    %4 = vector.broadcast %3 : vector<1x32xf32> to vector<16x32xf32>
    %5 = arith.addf %2, %4 : vector<16x32xf32>
    %cst_5 = arith.constant 0.000000e+00 : f32
    %6 = vector.broadcast %cst_5 : f32 to vector<16x32xf32>
    %7 = arith.maximumf %5, %6 : vector<16x32xf32>
    %c0_6 = arith.constant 0 : index
    %c0_7 = arith.constant 0 : index
    %8 = vector.load %arg4[%c0_6, %c0_7] : memref<32x32xf32, #tpu.memory_space<vmem>>, vector<32x32xf32>
    %cst_8 = arith.constant dense<0.000000e+00> : vector<16x32xf32>
    %9 = tpu.matmul %7, %8, %cst_8 {dimension_numbers = #tpu.dot_dimension_numbers<[1], [0], [0], [1], [0, 0, 1, 1], [], []>} : vector<16x32xf32>, vector<32x32xf32>, vector<16x32xf32> -> vector<16x32xf32>
    %c0_9 = arith.constant 0 : index
    %c0_10 = arith.constant 0 : index
    %10 = vector.load %arg5[%c0_9, %c0_10] : memref<1x32xf32, #tpu.memory_space<vmem>>, vector<1x32xf32>
    %11 = vector.broadcast %10 : vector<1x32xf32> to vector<16x32xf32>
    %12 = arith.addf %9, %11 : vector<16x32xf32>
    %cst_11 = arith.constant 0.000000e+00 : f32
    %13 = vector.broadcast %cst_11 : f32 to vector<16x32xf32>
    %14 = arith.maximumf %12, %13 : vector<16x32xf32>
    %c0_12 = arith.constant 0 : index
    %c0_13 = arith.constant 0 : index
    %15 = vector.load %arg6[%c0_12, %c0_13] : memref<1x32xf32, #tpu.memory_space<vmem>>, vector<1x32xf32>
    %cst_14 = arith.constant dense<0.000000e+00> : vector<1x16xf32>
    %16 = tpu.matmul %15, %14, %cst_14 {dimension_numbers = #tpu.dot_dimension_numbers<[1], [1], [0], [0], [0, 0, 1, 0], [], []>} : vector<1x32xf32>, vector<16x32xf32>, vector<1x16xf32> -> vector<1x16xf32>
    %c0_15 = arith.constant 0 : index
    %c0_16 = arith.constant 0 : index
    %17 = memref.load %arg7[%c0_15, %c0_16] : memref<1x1xf32, #tpu.memory_space<smem>>
    %18 = vector.broadcast %17 : f32 to vector<1x16xf32>
    %19 = arith.addf %16, %18 : vector<1x16xf32>
    %20 = vector.shape_cast %19 : vector<1x16xf32> to vector<1x1x16xf32>
    %c0_17 = arith.constant 0 : index
    %c0_18 = arith.constant 0 : index
    %c0_19 = arith.constant 0 : index
    %21 = vector.load %arg8[%c0_17, %c0_18, %c0_19] : memref<1x1x16xf32, #tpu.memory_space<vmem>>, vector<1x1x16xf32>
    tpu.vector_store %arg8[%c0_17, %c0_18, %c0_19], %20 {strides = array<i32>} : memref<1x1x16xf32, #tpu.memory_space<vmem>>, vector<1x1x16xf32>,
    return
  }
  func.func @transform_0(%arg0: i32) -> (i32, i32) {
    %c0_i32 = arith.constant 0 : i32
    %c0_i32_0 = arith.constant 0 : i32
    return %arg0, %c0_i32 : i32, i32
  }
  func.func @transform_1(%arg0: i32) -> (i32, i32) {
    %c0_i32 = arith.constant 0 : i32
    %c0_i32_0 = arith.constant 0 : i32
    %c0_i32_1 = arith.constant 0 : i32
    return %c0_i32, %c0_i32_0 : i32, i32
  }
  func.func @transform_2(%arg0: i32) -> (i32, i32) {
    %c0_i32 = arith.constant 0 : i32
    %c0_i32_0 = arith.constant 0 : i32
    %c0_i32_1 = arith.constant 0 : i32
    return %c0_i32, %c0_i32_0 : i32, i32
  }
  func.func @transform_3(%arg0: i32) -> (i32, i32) {
    %c0_i32 = arith.constant 0 : i32
    %c0_i32_0 = arith.constant 0 : i32
    %c0_i32_1 = arith.constant 0 : i32
    return %c0_i32, %c0_i32_0 : i32, i32
  }
  func.func @transform_4(%arg0: i32) -> (i32, i32) {
    %c0_i32 = arith.constant 0 : i32
    %c0_i32_0 = arith.constant 0 : i32
    %c0_i32_1 = arith.constant 0 : i32
    return %c0_i32, %c0_i32_0 : i32, i32
  }
  func.func @transform_5(%arg0: i32) -> (i32, i32) {
    %c0_i32 = arith.constant 0 : i32
    %c0_i32_0 = arith.constant 0 : i32
    %c0_i32_1 = arith.constant 0 : i32
    return %c0_i32, %c0_i32_0 : i32, i32
  }
  func.func @transform_6(%arg0: i32) -> (i32, i32) {
    %c0_i32 = arith.constant 0 : i32
    %c0_i32_0 = arith.constant 0 : i32
    %c0_i32_1 = arith.constant 0 : i32
    return %c0_i32, %c0_i32_0 : i32, i32
  }
  func.func @transform_7(%arg0: i32) -> (i32, i32, i32) {
    %c0_i32 = arith.constant 0 : i32
    %c0_i32_0 = arith.constant 0 : i32
    %c0_i32_1 = arith.constant 0 : i32
    return %arg0, %c0_i32, %c0_i32_0 : i32, i32, i32
  }
}

</mosaic_0001>

<bundles_post_ra>
// kernel: tpu_custom_call.1
= control target key start
LH: loop header
LB: loop body
LE: loop exit
PB: predicated region body
PF: predicated region fallthrough
CT: control target
= control target key end

     0   :  { %vm43_vm0 = vcmask 392192   ;;  %s505_s0 = inlined_call_operand.vmem [shape: f32[16,48], index: 0, kind: input, shape index: {}]   ;;  %s506_s1 = inlined_call_operand.vmem [shape: f32[48,32], index: 1, kind: input, shape index: {}]   ;;  %s507_s2 = inlined_call_operand.vmem [shape: f32[1,32], index: 2, kind: input, shape index: {}]   ;;  %s508_s3 = inlined_call_operand.vmem [shape: f32[32,32], index: 3, kind: input, shape index: {}]   ;;  %s509_s4 = inlined_call_operand.vmem [shape: f32[1,32], index: 4, kind: input, shape index: {}]   ;;  %s510_s5 = inlined_call_operand.vmem [shape: f32[1,32], index: 5, kind: input, shape index: {}]   ;;  %s511_s6 = inlined_call_operand.<no memory space> [shape: f32[1,1], index: 6, kind: input, shape index: {}]   ;;  %s512_s7 = inlined_call_operand.hbm [shape: f32[1,1,16], index: 7, kind: output, shape index: {}]  }
   0x1   :  { %v35_v0 = vld [vmem:[%s506_s1 + $0x28] sm:$0xff]  ;;  %v34_v1 = vld [vmem:[%s506_s1 + $0x20] sm:$0xff]  ;;  %v33_v2 = vld [vmem:[%s506_s1 + $0x18] sm:$0xff] }
   0x2   :  { %346 = vmatprep.subr.mxu0 %v35_v0  ;;  %v28_v3 = vld [vmem:[%s505_s0] sm:$0xff] }
   0x3   :  { %347 = vmatpush3.msra.mxu0 %v35_v0 }
   0x4   :  { %13 = vsyncpa [#allocation4], 0  ;;  %348 = vmatprep.subr.mxu0 %v34_v1  ;;  %358 = vmatprep.mubr.msk.f32.mxu0 %vm43_vm0, %v28_v3  ;;  %v32_v4 = vld [vmem:[%s506_s1 + $0x10] sm:$0xff]  ;;  %v31_v5 = vld [vmem:[%s506_s1 + $0x8] sm:$0xff]  ;;  %vm138_vm1 = vcmask 261120   ;;  %v404_v19 = vmov 0.0   ;;  %v224_v28 = vstv %s511_s6 }
   0x5   :  { %349 = vmatpush3.msra.mxu0 %v34_v1  ;;  %v30_v6 = vld [vmem:[%s506_s1] sm:$0xff]  ;;  %v29_v7 = vld [vmem:[%s505_s0 + $0x8] sm:$0xff]  ;;  %v130_v8 = vld [vmem:[%s508_s3 + $0x18] sm:$0xff]  ;;  %vm405_vm2 = vmmov 0   ;;  %vm304_vm3 = vcmask 122880  }
   0x6   :  { %350 = vmatprep.subr.mxu0 %v33_v2  ;;  %361 = vmatprep.subr.mxu1 %v130_v8  ;;  %v129_v9 = vld [vmem:[%s508_s3 + $0x10] sm:$0xff]  ;;  %v128_v10 = vld [vmem:[%s508_s3 + $0x8] sm:$0xff]  ;;  %v127_v11 = vld [vmem:[%s508_s3] sm:$0xff] }
   0x7   :  { %351 = vmatpush3.msra.mxu0 %v33_v2  ;;  %362 = vmatpush3.msra.mxu1 %v130_v8  ;;  %v320_v12 = vld [vmem:[%s507_s2] ss:$0 sm:$0xff] }
   0x8   :  { %352 = vmatprep.subr.mxu0 %v32_v4  ;;  %363 = vmatprep.subr.mxu1 %v129_v9  ;;  %v323_v20 = vld [vmem:[%s509_s4] ss:$0 sm:$0xff]  ;;  %s406_s4 = smov [#allocation3]  }
   0x9   :  { %353 = vmatpush3.msra.mxu0 %v32_v4  ;;  %364 = vmatpush3.msra.mxu1 %v129_v9  ;;  %v222_v27 = vld [vmem:[%s510_s5] sm:$0x1]  ;;  %s312_s29 = sshll.u32 %s406_s4, 4  ;;  %s313_s29 = int_to_ptr.vmem [resolvable:$true] %s312_s29 }
   0xa   :  { %354 = vmatprep.subr.mxu0 %v31_v5  ;;  %365 = vmatprep.subr.mxu1 %v128_v10  ;;  %s382_s30 = scalar_lea.vmem %s313_s29, 16  ;;  %s386_s8 = scalar_lea.vmem %s313_s29, 32 }
   0xb   :  { %355 = vmatpush3.msra.mxu0 %v31_v5  ;;  %366 = vmatpush3.msra.mxu1 %v128_v10  ;;  %p383_p0 = scmp.ne.s32.totalorder %s313_s29, %s382_s30  ;;  %p387_p1 = scmp.lt.s32.totalorder %s313_s29, %s313_s29 }
   0xc   :  { %356 = vmatprep.subr.mxu0 %v30_v6  ;;  %367 = vmatprep.subr.mxu1 %v127_v11  ;;  %p388_p2 = scmp.lt.s32.totalorder %s386_s8, %s382_s30 }
   0xd   :  { %357 = vmatpush3.msra.mxu0 %v30_v6  ;;  %368 = vmatpush3.msra.mxu1 %v127_v11 }
   0xe   :  { %359 = vmatmul.mubr.msk.f32.vlgmr.msra.gmra.mxu0 %vm43_vm0, %v29_v7  ;;  %372 = vmatprep.subr.mxu1 %v404_v19  ;;  %p389_p3 = por %p388_p2, %p387_p1 }
  0x10   :  { %p390_p4 = pnand %p389_p3, %p383_p0 }
  0xce   :  { %v360_v13 = vpop.f32.mrf.mxu0 }
  0xcf   :  { %v122_v14 = vadd.f32 %v360_v13, %v320_v12 }
  0xd0   :  { %v116_v15 = vpop.f32.mrf.mxu0 }
  0xd1   :  { %v117_v16 = vadd.f32 %v320_v12, %v116_v15  ;;  %v126_v18 = vmax.f32 %v122_v14, 0.0 }
  0xd3   :  { %v125_v17 = vmax.f32 %v117_v16, 0.0 }
  0xd5   :  { %369 = vmatprep.mubr.msk.f32.mxu1 %vm138_vm1, %v125_v17 }
  0xd6   :  { %370 = vmatmul.mubr.msk.f32.vlgmr.msra.gmra.mxu1 %vm138_vm1, %v126_v18 }
  0xd7   :  { %376 = vmatprep.mubr.msk.f32.mxu1 %vm405_vm2, %v404_v19 }
 0x196   :  { %v371_v21 = vpop.f32.mrf.mxu1 }
 0x197   :  { %v217_v22 = vadd.f32 %v371_v21, %v323_v20 }
 0x198   :  { %v211_v23 = vpop.f32.mrf.mxu1 }
 0x199   :  { %v221_v24 = vmax.f32 %v217_v22, 0.0  ;;  %v212_v25 = vadd.f32 %v323_v20, %v211_v23 }
 0x19b   :  { %373 = vmatpush3.xpose.msk.msra.mxu1 %vm138_vm1, %v221_v24  ;;  %v220_v26 = vmax.f32 %v212_v25, 0.0 }
 0x19c   :  { %374 = vmatprep.subr.mxu1 %v404_v19 }
 0x19f   :  { %375 = vmatpush3.xpose.msk.msra.mxu1 %vm138_vm1, %v220_v26 }
 0x1a2   :  { %377 = vmatmul.mubr.msk.f32.vlgmr.msra.gmra.mxu1 %vm138_vm1, %v222_v27 }
 0x262   :  { %v300_v29 = vpop.f32.mrf.mxu1 }
 0x263   :  { %v301_v30 = vadd.f32 %v300_v29, %v224_v28 }
 0x264   :  { %v378_v31 = vpop.f32.mrf.mxu1 }
 0x265   :  { %305 = vst.msk [vmem:[#allocation3] sm:$0x1] %vm304_vm3, %v301_v30 }
 0x266   :  { %393 = shalt.err (!%p390_p4)
}
 0x267   :  { %315 = dma.vmem_to_hbm [thread:$0]  %s313_s29, 16, %s512_s7, [#allocation4]  }
 0x268   :  { %402 = dma.done.wait [#allocation4], 16  }
 0x269   :  { %403 = vsyncadd [#allocation4], 4294967280 }
 0x26a   :  { %319 = vsyncpa [#allocation4], 1 }

</bundles_post_ra>
